<compile_context>
chip_gen: v5e
topology: v5e:2x2
jax: 0.10.0
libtpu: 0.0.40
codegen_flags: <defaults>
</compile_context>

<pallas_src>
import math

import jax
import jax.numpy as jnp
from jax.experimental import pallas as pl
from jax.experimental.pallas import tpu as pltpu

# ----------------------------- configuration -------------------------------
N = 8               # batch of timesteps
FREQ_DIM = 256      # frequency_embedding_size
HALF = FREQ_DIM // 2
HIDDEN = 128        # hidden_size
MAX_PERIOD = 10000.0


# ------------------------------- kernel ------------------------------------
def timestep_embedder_kernel(t_ref, freqs_ref, b1_ref, b2_ref,
                             w1c_hbm, w1s_hbm, w2_hbm,
                             o_ref,
                             w1c_vmem, w1s_vmem, w2_vmem, sem):
    # t_ref: (N, 1)   freqs_ref: (1, HALF)   b1/b2: (1, H) f32
    # w1c_hbm/w1s_hbm: (HALF, H) bf16 in HBM   w2_hbm: (H, H) bf16 in HBM
    # o_ref: (N, H) f32

    # Kick off all weight DMAs immediately so they run under the EUP work.
    cp_w1c = pltpu.make_async_copy(w1c_hbm, w1c_vmem, sem.at[0])
    cp_w1s = pltpu.make_async_copy(w1s_hbm, w1s_vmem, sem.at[1])
    cp_w2 = pltpu.make_async_copy(w2_hbm, w2_vmem, sem.at[2])
    cp_w1c.start()
    cp_w1s.start()
    cp_w2.start()

    # Sinusoidal embedding halves (f32 elementwise; cos/sin on the EUP).
    args = t_ref[...] * freqs_ref[...]            # (N, HALF)
    cos_e = jnp.cos(args)
    sin_e = jnp.sin(args)

    # First Linear, split across the [cos | sin] halves -> no lane-axis
    # concatenate is materialized.  bf16 only at the MXU inputs, f32 accum.
    cp_w1c.wait()
    cp_w1s.wait()
    h = jnp.dot(cos_e.astype(jnp.bfloat16), w1c_vmem[...],
                preferred_element_type=jnp.float32)
    h = h + jnp.dot(sin_e.astype(jnp.bfloat16), w1s_vmem[...],
                    preferred_element_type=jnp.float32)
    h = h + b1_ref[...]

    # SiLU: x * sigmoid(x) with sigmoid(x) = 0.5 * (1 + tanh(x/2)).
    h = h * (0.5 * jnp.tanh(0.5 * h) + 0.5)

    # Second Linear.
    cp_w2.wait()
    o_ref[...] = (jnp.dot(h.astype(jnp.bfloat16), w2_vmem[...],
                          preferred_element_type=jnp.float32)
                  + b2_ref[...])


# ------------------------------- wrapper ------------------------------------
def timestep_embedder(t, params):
    """t: (N,) float timesteps -> (N, HIDDEN) embedding, fully inside Pallas."""
    n = t.shape[0]
    t2d = t.astype(jnp.float32).reshape(n, 1)
    vmem = pl.BlockSpec(memory_space=pltpu.MemorySpace.VMEM)
    hbm = pl.BlockSpec(memory_space=pl.ANY)
    cost = pl.CostEstimate(
        flops=2 * n * (FREQ_DIM * HIDDEN + HIDDEN * HIDDEN),
        transcendentals=3 * n * HIDDEN,   # cos + sin + tanh
        bytes_accessed=(n * 4 + HALF * 4
                        + FREQ_DIM * HIDDEN * 2 + HIDDEN * HIDDEN * 2
                        + 2 * HIDDEN * 4 + n * HIDDEN * 4))
    return pl.pallas_call(
        timestep_embedder_kernel,
        out_shape=jax.ShapeDtypeStruct((n, HIDDEN), jnp.float32),
        in_specs=[vmem, vmem, vmem, vmem, hbm, hbm, hbm],
        out_specs=vmem,
        scratch_shapes=[
            pltpu.VMEM((HALF, HIDDEN), jnp.bfloat16),    # w1_cos landing buf
            pltpu.VMEM((HALF, HIDDEN), jnp.bfloat16),    # w1_sin landing buf
            pltpu.VMEM((HIDDEN, HIDDEN), jnp.bfloat16),  # w2 landing buf
            pltpu.SemaphoreType.DMA((3,)),
        ],
        cost_estimate=cost,
    )(t2d, params["freqs"], params["b1"], params["b2"],
      params["w1_cos"], params["w1_sin"], params["w2"])


# --------------------------- params / reference -----------------------------
def init_params(key):
    # TODO(synk): odd frequency_embedding_size would need the zero-pad column
    # from the PyTorch reference; FREQ_DIM is even here so it never triggers.
    assert FREQ_DIM % 2 == 0
    freqs = jnp.exp(-math.log(MAX_PERIOD)
                    * jnp.arange(HALF, dtype=jnp.float32) / HALF)
    k1, k2, k3, k4 = jax.random.split(key, 4)
    # PyTorch nn.Linear default init U(-1/sqrt(fan_in), +1/sqrt(fan_in));
    # weights stored as (in, out) so the kernel computes x @ W + b.
    lim1 = 1.0 / math.sqrt(FREQ_DIM)
    lim2 = 1.0 / math.sqrt(HIDDEN)
    w1 = jax.random.uniform(k1, (FREQ_DIM, HIDDEN), jnp.float32, -lim1, lim1)
    w2 = jax.random.uniform(k3, (HIDDEN, HIDDEN), jnp.float32, -lim2, lim2)
    return {
        "freqs": freqs.reshape(1, HALF),
        # bf16 weight storage (halves HBM->VMEM bytes); w1 pre-split so the
        # kernel never concatenates along the lane axis.  Biases stay f32.
        "w1_cos": w1[:HALF].astype(jnp.bfloat16),
        "w1_sin": w1[HALF:].astype(jnp.bfloat16),
        "w2": w2.astype(jnp.bfloat16),
        "b1": jax.random.uniform(k2, (1, HIDDEN), jnp.float32, -lim1, lim1),
        "b2": jax.random.uniform(k4, (1, HIDDEN), jnp.float32, -lim2, lim2),
    }


def timestep_embedder_ref(t, params):
    # Pure-JAX reference mirroring the PyTorch module (f32 math on the same,
    # bf16-rounded weights, so only the kernel's activation casts differ).
    args = t.astype(jnp.float32)[:, None] * params["freqs"][0][None, :]
    emb = jnp.concatenate([jnp.cos(args), jnp.sin(args)], axis=-1)
    w1 = jnp.concatenate([params["w1_cos"], params["w1_sin"]],
                         axis=0).astype(jnp.float32)
    h = emb @ w1 + params["b1"]
    h = h * jax.nn.sigmoid(h)
    return h @ params["w2"].astype(jnp.float32) + params["b2"]


# --------------------------------- main --------------------------------------
if __name__ == "__main__":
    key = jax.random.PRNGKey(0)
    k_param, k_t = jax.random.split(key)

    params = init_params(k_param)
    # Fractional timesteps in [0, 1000), as in a diffusion sampler.
    t = jax.random.uniform(k_t, (N,), jnp.float32, 0.0, 1000.0)

    out = jax.jit(timestep_embedder)(t, params)
    out = jax.block_until_ready(out)

    assert out.shape == (N, HIDDEN), out.shape
    assert bool(jnp.all(jnp.isfinite(out)))

    ref = timestep_embedder_ref(t, params)
    max_err = float(jnp.max(jnp.abs(out - ref)))
    assert max_err < 1e-2, f"max abs error vs reference: {max_err}"

    print("KERNEL_OK")
</pallas_src>

<mosaic_0001>
module attributes {stable_mosaic.version = 11 : i64} {
  func.func @timestep_embedder_kernel(%arg0: memref<8x1xf32, #tpu.memory_space<vmem>>, %arg1: memref<1x128xf32, #tpu.memory_space<vmem>>, %arg2: memref<1x128xf32, #tpu.memory_space<vmem>>, %arg3: memref<1x128xf32, #tpu.memory_space<vmem>>, %arg4: memref<128x128xbf16, #tpu.memory_space<any>>, %arg5: memref<128x128xbf16, #tpu.memory_space<any>>, %arg6: memref<128x128xbf16, #tpu.memory_space<any>>, %arg7: memref<8x128xf32, #tpu.memory_space<vmem>>, %arg8: memref<128x128xbf16, #tpu.memory_space<vmem>>, %arg9: memref<128x128xbf16, #tpu.memory_space<vmem>>, %arg10: memref<128x128xbf16, #tpu.memory_space<vmem>>, %arg11: memref<3x!tpu.dma_semaphore, #tpu.memory_space<semaphore_mem>>) attributes {dimension_semantics = [], scalar_prefetch = 0 : i64, scratch_operands = 4 : i64, tpu.core_type = #tpu.core_type<tc>} {
    %c0_i32 = arith.constant 0 : i32
    %0 = tpu.memref_slice %arg11[%c0_i32] : memref<3x!tpu.dma_semaphore, #tpu.memory_space<semaphore_mem>> -> memref<1x!tpu.dma_semaphore, #tpu.memory_space<semaphore_mem>>
    %1 = tpu.memref_squeeze %0 : memref<1x!tpu.dma_semaphore, #tpu.memory_space<semaphore_mem>> -> memref<!tpu.dma_semaphore, #tpu.memory_space<semaphore_mem>>
    tpu.enqueue_dma source(%arg4 : memref<128x128xbf16, #tpu.memory_space<any>>) target(%arg8 : memref<128x128xbf16, #tpu.memory_space<vmem>>) target_semaphore(%1 : memref<!tpu.dma_semaphore, #tpu.memory_space<semaphore_mem>>)
    %c1_i32 = arith.constant 1 : i32
    %2 = tpu.memref_slice %arg11[%c1_i32] : memref<3x!tpu.dma_semaphore, #tpu.memory_space<semaphore_mem>> -> memref<1x!tpu.dma_semaphore, #tpu.memory_space<semaphore_mem>>
    %3 = tpu.memref_squeeze %2 : memref<1x!tpu.dma_semaphore, #tpu.memory_space<semaphore_mem>> -> memref<!tpu.dma_semaphore, #tpu.memory_space<semaphore_mem>>
    tpu.enqueue_dma source(%arg5 : memref<128x128xbf16, #tpu.memory_space<any>>) target(%arg9 : memref<128x128xbf16, #tpu.memory_space<vmem>>) target_semaphore(%3 : memref<!tpu.dma_semaphore, #tpu.memory_space<semaphore_mem>>)
    %c2_i32 = arith.constant 2 : i32
    %4 = tpu.memref_slice %arg11[%c2_i32] : memref<3x!tpu.dma_semaphore, #tpu.memory_space<semaphore_mem>> -> memref<1x!tpu.dma_semaphore, #tpu.memory_space<semaphore_mem>>
    %5 = tpu.memref_squeeze %4 : memref<1x!tpu.dma_semaphore, #tpu.memory_space<semaphore_mem>> -> memref<!tpu.dma_semaphore, #tpu.memory_space<semaphore_mem>>
    tpu.enqueue_dma source(%arg6 : memref<128x128xbf16, #tpu.memory_space<any>>) target(%arg10 : memref<128x128xbf16, #tpu.memory_space<vmem>>) target_semaphore(%5 : memref<!tpu.dma_semaphore, #tpu.memory_space<semaphore_mem>>)
    %c0 = arith.constant 0 : index
    %c0_0 = arith.constant 0 : index
    %6 = vector.load %arg0[%c0, %c0_0] : memref<8x1xf32, #tpu.memory_space<vmem>>, vector<8x1xf32>
    %c0_1 = arith.constant 0 : index
    %c0_2 = arith.constant 0 : index
    %7 = vector.load %arg1[%c0_1, %c0_2] : memref<1x128xf32, #tpu.memory_space<vmem>>, vector<1x128xf32>
    %8 = vector.broadcast %6 : vector<8x1xf32> to vector<8x128xf32>
    %9 = vector.broadcast %7 : vector<1x128xf32> to vector<8x128xf32>
    %10 = arith.mulf %8, %9 : vector<8x128xf32>
    %11 = math.cos %10 : vector<8x128xf32>
    %12 = math.sin %10 : vector<8x128xf32>
    %c0_i32_3 = arith.constant 0 : i32
    %13 = tpu.memref_slice %arg11[%c0_i32_3] : memref<3x!tpu.dma_semaphore, #tpu.memory_space<semaphore_mem>> -> memref<1x!tpu.dma_semaphore, #tpu.memory_space<semaphore_mem>>
    %14 = tpu.memref_squeeze %13 : memref<1x!tpu.dma_semaphore, #tpu.memory_space<semaphore_mem>> -> memref<!tpu.dma_semaphore, #tpu.memory_space<semaphore_mem>>
    tpu.wait_dma2 semaphore(%14 : memref<!tpu.dma_semaphore, #tpu.memory_space<semaphore_mem>>) src(%arg4 : memref<128x128xbf16, #tpu.memory_space<any>>) dst(%arg8 : memref<128x128xbf16, #tpu.memory_space<vmem>>)
    %c1_i32_4 = arith.constant 1 : i32
    %15 = tpu.memref_slice %arg11[%c1_i32_4] : memref<3x!tpu.dma_semaphore, #tpu.memory_space<semaphore_mem>> -> memref<1x!tpu.dma_semaphore, #tpu.memory_space<semaphore_mem>>
    %16 = tpu.memref_squeeze %15 : memref<1x!tpu.dma_semaphore, #tpu.memory_space<semaphore_mem>> -> memref<!tpu.dma_semaphore, #tpu.memory_space<semaphore_mem>>
    tpu.wait_dma2 semaphore(%16 : memref<!tpu.dma_semaphore, #tpu.memory_space<semaphore_mem>>) src(%arg5 : memref<128x128xbf16, #tpu.memory_space<any>>) dst(%arg9 : memref<128x128xbf16, #tpu.memory_space<vmem>>)
    %17 = arith.truncf %11 : vector<8x128xf32> to vector<8x128xbf16>
    %c0_5 = arith.constant 0 : index
    %c0_6 = arith.constant 0 : index
    %18 = vector.load %arg8[%c0_5, %c0_6] : memref<128x128xbf16, #tpu.memory_space<vmem>>, vector<128x128xbf16>
    %cst = arith.constant dense<0.000000e+00> : vector<8x128xf32>
    %19 = tpu.matmul %17, %18, %cst {dimension_numbers = #tpu.dot_dimension_numbers<[1], [0], [0], [1], [0, 0, 1, 1], [], []>} : vector<8x128xbf16>, vector<128x128xbf16>, vector<8x128xf32> -> vector<8x128xf32>
    %20 = arith.truncf %12 : vector<8x128xf32> to vector<8x128xbf16>
    %c0_7 = arith.constant 0 : index
    %c0_8 = arith.constant 0 : index
    %21 = vector.load %arg9[%c0_7, %c0_8] : memref<128x128xbf16, #tpu.memory_space<vmem>>, vector<128x128xbf16>
    %cst_9 = arith.constant dense<0.000000e+00> : vector<8x128xf32>
    %22 = tpu.matmul %20, %21, %cst_9 {dimension_numbers = #tpu.dot_dimension_numbers<[1], [0], [0], [1], [0, 0, 1, 1], [], []>} : vector<8x128xbf16>, vector<128x128xbf16>, vector<8x128xf32> -> vector<8x128xf32>
    %23 = arith.addf %19, %22 : vector<8x128xf32>
    %c0_10 = arith.constant 0 : index
    %c0_11 = arith.constant 0 : index
    %24 = vector.load %arg2[%c0_10, %c0_11] : memref<1x128xf32, #tpu.memory_space<vmem>>, vector<1x128xf32>
    %25 = vector.broadcast %24 : vector<1x128xf32> to vector<8x128xf32>
    %26 = arith.addf %23, %25 : vector<8x128xf32>
    %cst_12 = arith.constant 5.000000e-01 : f32
    %27 = vector.broadcast %cst_12 : f32 to vector<8x128xf32>
    %28 = arith.mulf %27, %26 : vector<8x128xf32>
    %29 = math.tanh %28 : vector<8x128xf32>
    %cst_13 = arith.constant 5.000000e-01 : f32
    %30 = vector.broadcast %cst_13 : f32 to vector<8x128xf32>
    %31 = arith.mulf %30, %29 : vector<8x128xf32>
    %cst_14 = arith.constant 5.000000e-01 : f32
    %32 = vector.broadcast %cst_14 : f32 to vector<8x128xf32>
    %33 = arith.addf %31, %32 : vector<8x128xf32>
    %34 = arith.mulf %26, %33 : vector<8x128xf32>
    %c2_i32_15 = arith.constant 2 : i32
    %35 = tpu.memref_slice %arg11[%c2_i32_15] : memref<3x!tpu.dma_semaphore, #tpu.memory_space<semaphore_mem>> -> memref<1x!tpu.dma_semaphore, #tpu.memory_space<semaphore_mem>>
    %36 = tpu.memref_squeeze %35 : memref<1x!tpu.dma_semaphore, #tpu.memory_space<semaphore_mem>> -> memref<!tpu.dma_semaphore, #tpu.memory_space<semaphore_mem>>
    tpu.wait_dma2 semaphore(%36 : memref<!tpu.dma_semaphore, #tpu.memory_space<semaphore_mem>>) src(%arg6 : memref<128x128xbf16, #tpu.memory_space<any>>) dst(%arg10 : memref<128x128xbf16, #tpu.memory_space<vmem>>)
    %37 = arith.truncf %34 : vector<8x128xf32> to vector<8x128xbf16>
    %c0_16 = arith.constant 0 : index
    %c0_17 = arith.constant 0 : index
    %38 = vector.load %arg10[%c0_16, %c0_17] : memref<128x128xbf16, #tpu.memory_space<vmem>>, vector<128x128xbf16>
    %cst_18 = arith.constant dense<0.000000e+00> : vector<8x128xf32>
    %39 = tpu.matmul %37, %38, %cst_18 {dimension_numbers = #tpu.dot_dimension_numbers<[1], [0], [0], [1], [0, 0, 1, 1], [], []>} : vector<8x128xbf16>, vector<128x128xbf16>, vector<8x128xf32> -> vector<8x128xf32>
    %c0_19 = arith.constant 0 : index
    %c0_20 = arith.constant 0 : index
    %40 = vector.load %arg3[%c0_19, %c0_20] : memref<1x128xf32, #tpu.memory_space<vmem>>, vector<1x128xf32>
    %41 = vector.broadcast %40 : vector<1x128xf32> to vector<8x128xf32>
    %42 = arith.addf %39, %41 : vector<8x128xf32>
    %c0_21 = arith.constant 0 : index
    %c0_22 = arith.constant 0 : index
    %43 = vector.load %arg7[%c0_21, %c0_22] : memref<8x128xf32, #tpu.memory_space<vmem>>, vector<8x128xf32>
    tpu.vector_store %arg7[%c0_21, %c0_22], %42 {strides = array<i32>} : memref<8x128xf32, #tpu.memory_space<vmem>>, vector<8x128xf32>,
    return
  }
}

</mosaic_0001>

<bundles_post_ra>
// kernel: timestep_embedder.1
= control target key start
LH: loop header
LB: loop body
LE: loop exit
PB: predicated region body
PF: predicated region fallthrough
CT: control target
= control target key end

     0   :  { %v925_v1 = vmov 0   ;;  %s1061_s0 = inlined_call_operand.vmem [shape: f32[8,1], index: 0, kind: input, shape index: {}]   ;;  %s1062_s1 = inlined_call_operand.vmem [shape: f32[1,128], index: 1, kind: input, shape index: {}]   ;;  %s1063_s2 = inlined_call_operand.vmem [shape: f32[1,128], index: 2, kind: input, shape index: {}]   ;;  %s1064_s3 = inlined_call_operand.vmem [shape: f32[1,128], index: 3, kind: input, shape index: {}]   ;;  %s1065_s4 = inlined_call_operand.hbm [shape: bf16[128,128], index: 4, kind: input, shape index: {}]   ;;  %s1066_s5 = inlined_call_operand.hbm [shape: bf16[128,128], index: 5, kind: input, shape index: {}]   ;;  %s1067_s6 = inlined_call_operand.hbm [shape: bf16[128,128], index: 6, kind: input, shape index: {}]   ;;  %s1068_s7 = inlined_call_operand.hbm [shape: f32[8,128], index: 7, kind: output, shape index: {}]  }
   0x1   :  { %v62_v0 = vld [vmem:[%s1061_s0] sm:$0xff]  ;;  %815 = vset.pattern.permute.xlu0 %v925_v1 }
   0x2   :  { %66 = vperm.xlu0 %815, %v62_v0  }
   0x3   :  { %12 = vsyncpa [#allocation7], 0  ;;  %s28_s28 = sshll.u32 %s1065_s4, 4  ;;  %s926_s29 = smov [#allocation2]   ;;  %v816_v2 = vld [vmem:[%s1062_s1] ss:$0 sm:$0xff]  ;;  %s29_s28 = int_to_ptr.hbm [resolvable:$true] %s28_s28 }
   0x4   :  { %s30_s30 = sshll.u32 %s926_s29, 4  ;;  %s42_s10 = sshll.u32 %s1066_s5, 4  ;;  %v929_v16 = vmov 683565275   ;;  %v930_v18 = vmov 2475754826   ;;  %s31_s30 = int_to_ptr.vmem [resolvable:$true] %s30_s30  ;;  %s43_s10 = int_to_ptr.hbm [resolvable:$true] %s42_s10 }
   0x5   :  { %33 = dma.hbm_to_vmem [thread:$0]  %s29_s28, 1024, %s31_s30, [#allocation5]  ;;  %v931_v21 = vmov 2131351028   ;;  %v932_v24 = vmov 2102212464  }
   0x6   :  { %s927_s0 = smov [#allocation3]   ;;  %s56_s14 = sshll.u32 %s1067_s6, 4  ;;  %v933_v27 = vmov 920167782   ;;  %v934_v30 = vmov 1326507024   ;;  %s57_s14 = int_to_ptr.hbm [resolvable:$true] %s56_s14 }
   0x7   :  { %s44_s11 = sshll.u32 %s927_s0, 4  ;;  %s928_s4 = smov [#allocation4]   ;;  %s45_s11 = int_to_ptr.vmem [resolvable:$true] %s44_s11 }
   0x8   :  { %47 = dma.hbm_to_vmem [thread:$0]  %s43_s10, 1024, %s45_s11, [#allocation5 + $0x1] }
   0x9   :  { %s58_s15 = sshll.u32 %s928_s4, 4  ;;  %s59_s15 = int_to_ptr.vmem [resolvable:$true] %s58_s15 }
   0xa   :  { %61 = dma.hbm_to_vmem [thread:$0]  %s57_s14, 1024, %s59_s15, [#allocation5 + $0x2] }
  0x74   :  { %v67_v3 = vpop.permute.xlu0 %66 }
  0x75   :  { %v992_v4 = vmul.f32 %v816_v2, %v67_v3 }
  0x77   :  { %v76_v5 = vand.u32 2139095040, %v992_v4  ;;  %v73_v8 = vand.u32 2147483647, %v992_v4  ;;  %vm75_vm12 = vcmp.lt.s32.totalorder %v992_v4, 0 }
  0x79   :  { %v77_v6 = vshrl.u32 %v76_v5, 23  ;;  %v80_v10 = vand.u32 8388607, %v73_v8  ;;  %vm74_vm13 = vcmp.le.f32.partialorder %v73_v8, 0.7853982 }
  0x7b   :  { %v675_v7 = vadd.s32 4294967169, %v77_v6  ;;  %v81_v14 = vor.u32 8388608, %v80_v10 }
  0x7d   :  { %v83_v9 = vadd.s32 1, %v675_v7  ;;  %v1009_v37 = vshll.u32 %v81_v14, 8 }
  0x7f   :  { %vm84_vm0 = vcmp.gt.s32.totalorder %v83_v9, 0  ;;  %v122_v46 = vand.u32 65535, %v1009_v37  ;;  %v123_v47 = vshrl.u32 %v1009_v37, 16 }
  0x80   :  { %v85_v11 = vsel %vm84_vm0, %v83_v9, 0 }
  0x81   :  { %v87_v12 = vand.u32 31, %v85_v11  ;;  %v1000_v15 = vshrl.u32 %v85_v11, 5 }
  0x83   :  { %v998_v13 = vsub.s32 32, %v87_v12  ;;  %v90_v17 = vshll.u32 %v929_v16, %v87_v12  ;;  %v93_v19 = vshll.u32 %v930_v18, %v87_v12  ;;  %v96_v23 = vshll.u32 %v931_v21, %v87_v12 }
  0x84   :  { %v99_v26 = vshll.u32 %v932_v24, %v87_v12  ;;  %v102_v29 = vshll.u32 %v933_v27, %v87_v12  ;;  %vm105_vm1 = vcmp.lt.s32.totalorder %v1000_v15, 1  ;;  %vm108_vm2 = vcmp.lt.s32.totalorder %v1000_v15, 4 }
  0x85   :  { %v91_v20 = vshrl.u32 %v930_v18, %v998_v13  ;;  %v94_v22 = vshrl.u32 %v931_v21, %v998_v13  ;;  %v97_v25 = vshrl.u32 %v932_v24, %v998_v13  ;;  %v100_v28 = vshrl.u32 %v933_v27, %v998_v13 }
  0x86   :  { %v103_v31 = vshrl.u32 %v934_v30, %v998_v13  ;;  %vm107_vm3 = vcmp.lt.s32.totalorder %v1000_v15, 3  ;;  %vm106_vm4 = vcmp.lt.s32.totalorder %v1000_v15, 2  ;;  %v89_v11 = vshrl.u32 %v929_v16, %v998_v13 }
  0x87   :  { %v92_v32 = vor.u32 %v91_v20, %v90_v17  ;;  %v95_v33 = vor.u32 %v94_v22, %v93_v19  ;;  %v98_v34 = vor.u32 %v97_v25, %v96_v23  ;;  %v101_v35 = vor.u32 %v100_v28, %v99_v26 }
  0x88   :  { %v104_v36 = vor.u32 %v103_v31, %v102_v29 }
  0x89   :  { %v113_v38 = vsel %vm105_vm1, %v92_v32, %v95_v33  ;;  %v117_v39 = vsel %vm105_vm1, %v95_v33, %v98_v34  ;;  %v114_v40 = vsel %vm108_vm2, %v101_v35, 920167782  ;;  %v110_v7 = vsel %vm108_vm2, %v98_v34, 2102212464 }
  0x8a   :  { %v118_v41 = vsel %vm108_vm2, %v104_v36, 1326507024  ;;  %v115_v42 = vsel %vm107_vm3, %v98_v34, %v114_v40  ;;  %v109_v20 = vsel %vm105_vm1, %v89_v11, %v92_v32  ;;  %v111_v21 = vsel %vm107_vm3, %v95_v33, %v110_v7 }
  0x8b   :  { %v119_v43 = vsel %vm107_vm3, %v101_v35, %v118_v41  ;;  %v116_v44 = vsel %vm106_vm4, %v113_v38, %v115_v42  ;;  %v112_v13 = vsel %vm106_vm4, %v109_v20, %v111_v21 }
  0x8c   :  { %v120_v45 = vsel %vm106_vm4, %v117_v39, %v119_v43  ;;  %v146_v50 = vand.u32 65535, %v116_v44  ;;  %v147_v51 = vshrl.u32 %v116_v44, 16  ;;  %v166_v28 = vmul.u32 %v1009_v37, %v112_v13 }
  0x8d   :  { %v124_v48 = vand.u32 65535, %v120_v45  ;;  %v125_v49 = vshrl.u32 %v120_v45, 16  ;;  %vm216_vm4 = vweird.f32 %v992_v4 }
  0x8e   :  { %v149_v54 = vmul.u32 %v147_v51, %v122_v46  ;;  %v150_v55 = vmul.u32 %v146_v50, %v123_v47  ;;  %v148_v59 = vmul.u32 %v146_v50, %v122_v46  ;;  %v151_v63 = vmul.u32 %v147_v51, %v123_v47 }
  0x8f   :  { %v127_v52 = vmul.u32 %v125_v49, %v122_v46  ;;  %v128_v53 = vmul.u32 %v124_v48, %v123_v47  ;;  %v126_v56 = vmul.u32 %v124_v48, %v122_v46  ;;  %v129_v58 = vmul.u32 %v125_v49, %v123_v47 }
  0x90   :  { %v152_v60 = vshll.u32 %v149_v54, 16  ;;  %v154_v2 = vshll.u32 %v150_v55, 16  ;;  %v153_v18 = vshrl.u32 %v149_v54, 16  ;;  %v155_v24 = vshrl.u32 %v150_v55, 16 }
  0x91   :  { %v130_v57 = vshll.u32 %v127_v52, 16  ;;  %v132_v61 = vshll.u32 %v128_v53, 16  ;;  %v131_v12 = vshrl.u32 %v127_v52, 16  ;;  %v133_v22 = vshrl.u32 %v128_v53, 16 }
  0x92   :  { %vm156_vm6 = vc.u32 %v148_v59, %v152_v60  ;;  %v158_v3 = vadd.s32 %v152_v60, %v148_v59 }
  0x93   :  { %vm134_vm5 = vc.u32 %v126_v56, %v130_v57  ;;  %v136_v62 = vadd.s32 %v130_v57, %v126_v56  ;;  %v157_v6 = vsel %vm156_vm6, 1, %v925_v1 }
  0x94   :  { %v135_v0 = vsel %vm134_vm5, 1, %v925_v1  ;;  %v159_v10 = vadd.s32 %v157_v6, %v151_v63  ;;  %vm160_vm8 = vc.u32 %v158_v3, %v154_v2  ;;  %v162_v27 = vadd.s32 %v158_v3, %v154_v2 }
  0x95   :  { %v137_v5 = vadd.s32 %v135_v0, %v129_v58  ;;  %vm138_vm7 = vc.u32 %v136_v62, %v132_v61  ;;  %v161_v17 = vsel %vm160_vm8, 1, %v925_v1 }
  0x96   :  { %v139_v9 = vsel %vm138_vm7, 1, %v925_v1  ;;  %v163_v19 = vadd.s32 %v161_v17, %v159_v10 }
  0x97   :  { %v141_v14 = vadd.s32 %v139_v9, %v137_v5 }
  0x98   :  { %v164_v25 = vadd.s32 %v163_v19, %v153_v18 }
  0x99   :  { %v142_v23 = vadd.s32 %v141_v14, %v131_v12 }
  0x9a   :  { %v165_v16 = vadd.s32 %v164_v25, %v155_v24 }
  0x9b   :  { %v143_v26 = vadd.s32 %v142_v23, %v133_v22 }
  0x9c   :  { %v169_v1 = vadd.s32 1, %v165_v16 }
  0x9d   :  { %vm168_vm9 = vc.u32 %v143_v26, %v162_v27  ;;  %v167_v15 = vadd.s32 %v162_v27, %v143_v26 }
  0x9e   :  { %v170_v29 = vsel %vm168_vm9, %v169_v1, %v165_v16 }
  0x9f   :  { %v171_v30 = vadd.s32 %v170_v29, %v166_v28 }
  0xa1   :  { %v172_v31 = vadd.s32 536870912, %v171_v30 }
  0xa3   :  { %v173_v32 = vshrl.u32 %v172_v31, 30 }
  0xa5   :  { %v174_v34 = vshll.u32 %v173_v32, 30  ;;  %v197_v53 = vsub.s32 4, %v173_v32 }
  0xa7   :  { %v175_v33 = vsub.s32 %v171_v30, %v174_v34  ;;  %v198_v58 = vsel %vm75_vm12, %v197_v53, %v173_v32 }
  0xa8   :  { %v200_v61 = vsel %vm74_vm13, 0, %v198_v58 }
  0xa9   :  { %vm176_vm10 = vcmp.lt.s32.totalorder %v175_v33, 0  ;;  %v177_v35 = vsub.s32 0, %v175_v33  ;;  %v371_v3 = vadd.s32 3, %v200_v61  ;;  %v217_v9 = vand.u32 3, %v200_v61 }
  0xab   :  { %v178_v36 = vsel %vm176_vm10, %v177_v35, %v175_v33  ;;  %v372_v10 = vand.u32 3, %v371_v3  ;;  %vm218_vm14 = vcmp.lt.s32.totalorder %v217_v9, 2  ;;  %vm219_vm15 = vcmp.eq.s32.totalorder %v217_v9, 0 }
  0xac   :  { %v179_v38 = vclz %v178_v36  ;;  %vm222_vm0 = vcmp.eq.s32.totalorder %v217_v9, 2 }
  0xad   :  { %vm373_vm1 = vcmp.lt.s32.totalorder %v372_v10, 2  ;;  %vm374_vm2 = vcmp.eq.s32.totalorder %v372_v10, 0  ;;  %vm377_vm3 = vcmp.eq.s32.totalorder %v372_v10, 2 }
  0xae   :  { %v676_v39 = vadd.s32 4294967294, %v179_v38 }
  0xb0   :  { %vm677_vm11 = vcmp.lt.s32.totalorder %v676_v39, 0 }
  0xb1   :  { %v182_v40 = vsel %vm677_vm11, 0, %v676_v39 }
  0xb2   :  { %v183_v41 = vsub.s32 32, %v182_v40  ;;  %v187_v42 = vsub.s32 4294967266, %v182_v40  ;;  %v184_v43 = vshll.u32 %v175_v33, %v182_v40 }
  0xb4   :  { %v185_v44 = vshrl.u32 %v167_v15, %v183_v41  ;;  %v188_v45 = vadd.s32 127, %v187_v42 }
  0xb6   :  { %v186_v37 = vor.u32 %v185_v44, %v184_v43  ;;  %v189_v46 = vshll.u32 %v188_v45, 23 }
  0xb8   :  { %v190_v47 = vor.u32 4788187, %v189_v46  ;;  %v193_v49 = vcvt.s32.f32 %v186_v37 }
  0xba   :  { %v191_v48 = vand.u32 2147483647, %v190_v47 }
  0xbc   :  { %v194_v50 = vmul.f32 %v193_v49, %v191_v48 }
  0xbe   :  { %v195_v51 = vxor.u32 2147483648, %v194_v50 }
  0xc0   :  { %v196_v52 = vsel %vm75_vm12, %v195_v51, %v194_v50 }
  0xc1   :  { %v199_v54 = vsel %vm74_vm13, %v992_v4, %v196_v52 }
  0xc2   :  { %v201_v55 = vmul.f32 %v199_v54, %v199_v54 }
  0xc4   :  { %v202_v56 = vmul.f32 -0.001358992, %v201_v55  ;;  %v209_v57 = vmul.f32 -0.00019511016, %v201_v55 }
  0xc6   :  { %v203_v59 = vadd.f32 0.041655596, %v202_v56  ;;  %v210_v60 = vadd.f32 0.008332121, %v209_v57 }
  0xc8   :  { %v204_v62 = vmul.f32 %v203_v59, %v201_v55  ;;  %v211_v63 = vmul.f32 %v210_v60, %v201_v55 }
  0xca   :  { %v205_v0 = vadd.f32 -0.4999988, %v204_v62  ;;  %v212_v2 = vadd.f32 -0.16666654, %v211_v63 }
  0xcc   :  { %v206_v5 = vmul.f32 %v205_v0, %v201_v55  ;;  %v213_v6 = vmul.f32 %v212_v2, %v201_v55 }
  0xce   :  { %v207_v7 = vadd.f32 1.0, %v206_v5  ;;  %v214_v8 = vadd.f32 1.0, %v213_v6 }
  0xd0   :  { %v215_v11 = vmul.f32 %v214_v8, %v199_v54  ;;  %v223_v12 = vxor.u32 2147483648, %v207_v7 }
  0xd2   :  { %v220_v14 = vxor.u32 2147483648, %v215_v11  ;;  %v224_v18 = vsel %vm222_vm0, %v223_v12, %v215_v11  ;;  %v379_v20 = vsel %vm377_vm3, %v223_v12, %v215_v11 }
  0xd4   :  { %v221_v17 = vsel %vm219_vm15, %v207_v7, %v220_v14  ;;  %v376_v19 = vsel %vm374_vm2, %v207_v7, %v220_v14 }
  0xd5   :  { %v225_v21 = vsel %vm218_vm14, %v221_v17, %v224_v18  ;;  %v380_v22 = vsel %vm373_vm1, %v376_v19, %v379_v20 }
  0xd6   :  { %v226_v23 = vsel %vm216_vm4, nan, %v225_v21  ;;  %v381_v24 = vsel %vm216_vm4, nan, %v380_v22 }
  0xd7   :  { %917 = dma.done.wait [#allocation5], 1024 }
  0xd8   :  { %918 = vsyncadd [#allocation5], 4294966272 }
  0xd9   :  { %919 = dma.done.wait [#allocation5 + $0x1], 1024 }
  0xda   :  { %920 = vsyncadd [#allocation5 + $0x1], 4294966272  ;;  %v795_v25 = vld [vmem:[#allocation3 + $0x38] sm:$0xff]  ;;  %v794_v27 = vld [vmem:[#allocation3 + $0x30] sm:$0xff]  ;;  %v405_v38 = vpack.c.bf16 %v381_v24, %v381_v24  ;;  %v388_v39 = vpack.c.bf16 %v226_v23, %v226_v23 }
  0xdb   :  { %v787_v26 = vld [vmem:[#allocation2 + $0x38] sm:$0xff]  ;;  %470 = vmatpush.bf16.msra.mxu0 %v795_v25  ;;  %v786_v13 = vld [vmem:[#allocation2 + $0x30] sm:$0xff]  ;;  %v793_v16 = vld [vmem:[#allocation3 + $0x28] sm:$0xff] }
  0xdc   :  { %531 = vmatpush.bf16.msra.mxu1 %v787_v26  ;;  %v785_v1 = vld [vmem:[#allocation2 + $0x28] sm:$0xff]  ;;  %v792_v4 = vld [vmem:[#allocation3 + $0x20] sm:$0xff]  ;;  %v791_v29 = vld [vmem:[#allocation3 + $0x18] sm:$0xff] }
  0xdd   :  { %v784_v28 = vld [vmem:[#allocation2 + $0x20] sm:$0xff]  ;;  %v783_v30 = vld [vmem:[#allocation2 + $0x18] sm:$0xff]  ;;  %v790_v31 = vld [vmem:[#allocation3 + $0x10] sm:$0xff] }
  0xde   :  { %v782_v32 = vld [vmem:[#allocation2 + $0x10] sm:$0xff]  ;;  %v789_v34 = vld [vmem:[#allocation3 + $0x8] sm:$0xff]  ;;  %v788_v35 = vld [vmem:[#allocation3] sm:$0xff] }
  0xdf   :  { %471 = vmatpush.bf16.msra.mxu0 %v794_v27  ;;  %v781_v33 = vld [vmem:[#allocation2 + $0x8] sm:$0xff]  ;;  %v780_v36 = vld [vmem:[#allocation2] sm:$0xff] }
  0xe0   :  { %532 = vmatpush.bf16.msra.mxu1 %v786_v13  ;;  %v817_v40 = vld [vmem:[%s1063_s2] ss:$0 sm:$0xff] }
  0xe3   :  { %472 = vmatpush.bf16.msra.mxu0 %v793_v16 }
  0xe4   :  { %533 = vmatpush.bf16.msra.mxu1 %v785_v1 }
  0xe7   :  { %473 = vmatpush.bf16.msra.mxu0 %v792_v4 }
  0xe8   :  { %534 = vmatpush.bf16.msra.mxu1 %v784_v28 }
  0xeb   :  { %474 = vmatpush.bf16.msra.mxu0 %v791_v29 }
  0xec   :  { %535 = vmatpush.bf16.msra.mxu1 %v783_v30 }
  0xef   :  { %475 = vmatpush.bf16.msra.mxu0 %v790_v31 }
  0xf0   :  { %536 = vmatpush.bf16.msra.mxu1 %v782_v32 }
  0xf3   :  { %476 = vmatpush.bf16.msra.mxu0 %v789_v34 }
  0xf4   :  { %537 = vmatpush.bf16.msra.mxu1 %v781_v33 }
  0xf7   :  { %477 = vmatpush.bf16.msra.mxu0 %v788_v35 }
  0xf8   :  { %538 = vmatpush.bf16.msra.mxu1 %v780_v36 }
  0xfa   :  { %478 = vmatmul.bf16.vlgmr.msra.gmra.mxu0 %v405_v38 }
  0xfb   :  { %539 = vmatmul.bf16.vlgmr.msra.gmra.mxu1 %v388_v39 }
 0x177   :  { %v479_v15 = vpop.f32.mrf.mxu0 }
 0x178   :  { %v540_v41 = vpop.f32.mrf.mxu1 }
 0x179   :  { %v541_v42 = vadd.f32 %v540_v41, %v479_v15 }
 0x17b   :  { %v548_v43 = vadd.f32 %v817_v40, %v541_v42 }
 0x17d   :  { %v549_v44 = vmul.f32 0.5, %v548_v43 }
 0x17f   :  { %818 = vtanh.f32 %v549_v44  ;;  %v481_v45 = vpop.f32.mrf.mxu0 }
 0x180   :  { %v542_v37 = vpop.f32.mrf.mxu1 }
 0x185   :  { %v819_v46 = vpop.eup %818 }
 0x186   :  { %v551_v47 = vmul.f32 0.5, %v819_v46 }
 0x188   :  { %v552_v48 = vadd.f32 0.5, %v551_v47 }
 0x18a   :  { %v553_v49 = vmul.f32 %v552_v48, %v548_v43 }
 0x18b   :  { %921 = dma.done.wait [#allocation5 + $0x2], 1024 }
 0x18c   :  { %922 = vsyncadd [#allocation5 + $0x2], 4294966272  ;;  %v803_v50 = vld [vmem:[#allocation4 + $0x38] sm:$0xff]  ;;  %v802_v51 = vld [vmem:[#allocation4 + $0x30] sm:$0xff]  ;;  %v556_v58 = vpack.c.bf16 %v553_v49, %v553_v49  ;;  %s935_s18 = smov [#allocation6]   ;;  %s646_s22 = sshll.u32 %s1068_s7, 4  ;;  %s647_s22 = int_to_ptr.hbm [resolvable:$true] %s646_s22 }
 0x18d   :  { %625 = vmatpush.bf16.msra.mxu2 %v803_v50  ;;  %v801_v52 = vld [vmem:[#allocation4 + $0x28] sm:$0xff]  ;;  %v800_v53 = vld [vmem:[#allocation4 + $0x20] sm:$0xff]  ;;  %v799_v54 = vld [vmem:[#allocation4 + $0x18] sm:$0xff]  ;;  %s644_s19 = sshll.u32 %s935_s18, 4  ;;  %s645_s19 = int_to_ptr.vmem [resolvable:$true] %s644_s19 }
 0x18e   :  { %v798_v55 = vld [vmem:[#allocation4 + $0x10] sm:$0xff]  ;;  %v797_v56 = vld [vmem:[#allocation4 + $0x8] sm:$0xff]  ;;  %v796_v57 = vld [vmem:[#allocation4] sm:$0xff] }
 0x18f   :  { %v820_v59 = vld [vmem:[%s1064_s3] ss:$0 sm:$0xff] }
 0x191   :  { %626 = vmatpush.bf16.msra.mxu2 %v802_v51 }
 0x195   :  { %627 = vmatpush.bf16.msra.mxu2 %v801_v52 }
 0x199   :  { %628 = vmatpush.bf16.msra.mxu2 %v800_v53 }
 0x19d   :  { %629 = vmatpush.bf16.msra.mxu2 %v799_v54 }
 0x1a1   :  { %630 = vmatpush.bf16.msra.mxu2 %v798_v55 }
 0x1a5   :  { %631 = vmatpush.bf16.msra.mxu2 %v797_v56 }
 0x1a9   :  { %632 = vmatpush.bf16.msra.mxu2 %v796_v57 }
 0x1ac   :  { %633 = vmatmul.bf16.vlgmr.msra.gmra.mxu2 %v556_v58 }
 0x22f   :  { %v634_v60 = vpop.f32.mrf.mxu2 }
 0x230   :  { %v635_v61 = vadd.f32 %v820_v59, %v634_v60 }
 0x232   :  { %638 = vst [vmem:[#allocation6] sm:$0xff] %v635_v61 }
 0x233   :  { %649 = dma.vmem_to_hbm [thread:$0]  %s645_s19, 128, %s647_s22, [#allocation7]  }
 0x237   :  { %v636_v62 = vpop.f32.mrf.mxu2 }
 0x238   :  { %923 = dma.done.wait [#allocation7], 128  }
 0x239   :  { %924 = vsyncadd [#allocation7], 4294967168 }
 0x23a   :  { %654 = vsyncpa [#allocation7], 1 }
 0x23b   :  { %655 = vsyncmov [#allocation5] }
 0x23e   :  { %s656_s23 = vpop.sfrf %655 }
 0x23f   :  { %p777_p0 = scmp.ne.s32.totalorder %s656_s23, 0 }
 0x241   :  { %660 = shalt.err (%p777_p0)  }
 0x242   :  { %662 = vsyncmov [#allocation5 + $0x1] }
 0x245   :  { %s663_s3 = vpop.sfrf %662 }
 0x246   :  { %p778_p1 = scmp.ne.s32.totalorder %s663_s3, 0 }
 0x248   :  { %667 = shalt.err (%p778_p1)  }
 0x249   :  { %669 = vsyncmov [#allocation5 + $0x2] }
 0x24c   :  { %s670_s7 = vpop.sfrf %669 }
 0x24d   :  { %p779_p2 = scmp.ne.s32.totalorder %s670_s7, 0 }
 0x24f   :  { %674 = shalt.err (%p779_p2)  }

</bundles_post_ra>
